<compile_context>
chip_gen: v6e
topology: v6e:2x2x1
jax: 0.10.0
libtpu: 0.0.40
codegen_flags: <defaults>
</compile_context>

<pallas_src>
import jax
import jax.numpy as jnp
from jax.experimental import pallas as pl
from jax.experimental.pallas import tpu as pltpu


# ---------------------------------------------------------------------------
# Bilinear interpolation matrix (PyTorch F.interpolate, mode='bilinear',
# align_corners=False semantics), 1-D.  Rows sum to 1.
# ---------------------------------------------------------------------------
def bilinear_matrix(out_size: int, in_size: int) -> jnp.ndarray:
    if out_size == in_size:
        return jnp.eye(out_size, dtype=jnp.float32)
    scale = in_size / out_size
    i = jnp.arange(out_size, dtype=jnp.float32)
    src = (i + 0.5) * scale - 0.5
    src = jnp.maximum(src, 0.0)                       # PyTorch clamps negative src to 0
    i0 = jnp.floor(src).astype(jnp.int32)
    i0 = jnp.minimum(i0, in_size - 1)
    i1 = jnp.minimum(i0 + 1, in_size - 1)
    w1 = src - i0.astype(jnp.float32)
    w0 = 1.0 - w1
    rows = jnp.arange(out_size)
    m = jnp.zeros((out_size, in_size), jnp.float32)
    m = m.at[rows, i0].add(w0)
    m = m.at[rows, i1].add(w1)
    return m


# ---------------------------------------------------------------------------
# Kernel 1: half-resolution gating map  a = sigmoid(psi(relu(Wx + Wg)))
#   layout: channels on rows (sublanes), flattened half-res spatial on lanes.
# ---------------------------------------------------------------------------
def _gate_map_kernel(xp_ref, gr_ref, wxw_ref, wgw_ref, wgb_ref,
                     psiw_ref, psib_ref, a_ref):
    # W_x: 2x2 / stride-2 conv as ONE MXU matmul:  (C, Cx*4) @ (Cx*4, Hh*Wh)
    wx = jnp.dot(wxw_ref[...], xp_ref[0], preferred_element_type=jnp.float32)

    # W_g: 1x1 conv + bias on the pre-resized g:   (C, Cg) @ (Cg, Hh*Wh)
    wg = jnp.dot(wgw_ref[...], gr_ref[0], preferred_element_type=jnp.float32)
    wg = wg + wgb_ref[...]                                  # (C, 1) broadcasts over lanes

    f = jnp.maximum(wx + wg, 0.0)                           # (C, Hh*Wh)

    # psi: C -> 1 on the VPU (broadcast-mul + sublane reduce), lane-dense result.
    logits = jnp.sum(f * psiw_ref[...], axis=0, keepdims=True) + psib_ref[...]
    a_ref[0] = jax.nn.sigmoid(logits)                       # (1, Hh*Wh)


# ---------------------------------------------------------------------------
# Kernel 2: separable bilinear upsample of `a` (two small matmuls) + gating,
#           NCHW in / NCHW out (no transposes).
# ---------------------------------------------------------------------------
def _upsample_gate_kernel(a_ref, x_ref, uh_ref, uwt_ref, o_ref):
    a = a_ref[0]                                                           # (Hh, Wh)
    aw = jnp.dot(a, uwt_ref[...], preferred_element_type=jnp.float32)      # (Hh, W)
    a_up = jnp.dot(uh_ref[...], aw, preferred_element_type=jnp.float32)    # (H, W)
    o_ref[0] = (x_ref[0] * a_up[None, :, :]).astype(o_ref.dtype)           # (Cx, H, W)


# ---------------------------------------------------------------------------
# Wrapper.
# ---------------------------------------------------------------------------
def attention_gate(x, g, params, *, matmul_dtype=None):
    N, Cx, H, W = x.shape
    Ng, Cg, Hg, Wg = g.shape
    assert Ng == N
    assert H % 2 == 0 and W % 2 == 0, "k=2/s=2 conv drops odd rows/cols"
    Hh, Wh = H // 2, W // 2
    out_c = params["wx_w"].shape[0]

    f32 = jnp.float32
    cdt = matmul_dtype if matmul_dtype is not None else x.dtype

    # --- glue: stride-2 2x2 patches of x, channel-major rows (c, ki, kj) -------
    xp = (x.reshape(N, Cx, Hh, 2, Wh, 2)
            .transpose(0, 1, 3, 5, 2, 4)
            .reshape(N, Cx * 4, Hh * Wh)).astype(cdt)

    # --- glue: pre-resize g to (Hh, Wh) with separable bilinear (exact swap
    #     with the 1x1 conv; replaces the old dense kron matmul) ----------------
    Mh = bilinear_matrix(Hh, Hg)
    Mw = bilinear_matrix(Wh, Wg)
    gr = jnp.einsum("hp,wq,ncpq->nchw", Mh, Mw, g.astype(f32))
    gr = gr.reshape(N, Cg, Hh * Wh).astype(cdt)

    # --- glue: parameters, channels-first 2-D ----------------------------------
    wxw = params["wx_w"].reshape(out_c, Cx * 4).astype(cdt)     # (C, Cx*4)
    wgw = params["wg_w"].reshape(out_c, Cg).astype(cdt)         # (C, Cg)
    wgb = params["wg_b"].reshape(out_c, 1).astype(f32)          # (C, 1)
    psiw = params["psi_w"].reshape(1, out_c).T.astype(f32)      # (C, 1)
    psib = params["psi_b"].reshape(1, 1).astype(f32)            # (1, 1)

    # --- glue: separable upsample matrices for `a` ------------------------------
    Uh = bilinear_matrix(H, Hh)             # (H, Hh)
    UwT = bilinear_matrix(W, Wh).T          # (Wh, W)

    cparams = pltpu.CompilerParams(
        dimension_semantics=("parallel",),          # batch axis -> 2-TC sharding on v7x
        vmem_limit_bytes=64 * 1024 * 1024,
    )

    # --- kernel 1: half-res gating map, lane-dense (1, Hh*Wh) per batch --------
    a_half = pl.pallas_call(
        _gate_map_kernel,
        out_shape=jax.ShapeDtypeStruct((N, 1, Hh * Wh), jnp.float32),
        grid_spec=pltpu.PrefetchScalarGridSpec(
            num_scalar_prefetch=0,
            grid=(N,),
            in_specs=[
                pl.BlockSpec((1, Cx * 4, Hh * Wh), lambda n: (n, 0, 0)),   # xp
                pl.BlockSpec((1, Cg, Hh * Wh),     lambda n: (n, 0, 0)),   # gr
                pl.BlockSpec((out_c, Cx * 4),      lambda n: (0, 0)),      # wxw
                pl.BlockSpec((out_c, Cg),          lambda n: (0, 0)),      # wgw
                pl.BlockSpec((out_c, 1),           lambda n: (0, 0)),      # wgb
                pl.BlockSpec((out_c, 1),           lambda n: (0, 0)),      # psiw
                pl.BlockSpec((1, 1),               lambda n: (0, 0)),      # psib
            ],
            out_specs=pl.BlockSpec((1, 1, Hh * Wh), lambda n: (n, 0, 0)),
        ),
        compiler_params=cparams,
    )(xp, gr, wxw, wgw, wgb, psiw, psib)

    # --- kernel 2: upsample + gate, native NCHW ---------------------------------
    a2d = a_half.reshape(N, Hh, Wh)      # pure reshape (metadata only)
    out = pl.pallas_call(
        _upsample_gate_kernel,
        out_shape=jax.ShapeDtypeStruct((N, Cx, H, W), x.dtype),
        grid_spec=pltpu.PrefetchScalarGridSpec(
            num_scalar_prefetch=0,
            grid=(N,),
            in_specs=[
                pl.BlockSpec((1, Hh, Wh),   lambda n: (n, 0, 0)),          # a (2-D)
                pl.BlockSpec((1, Cx, H, W), lambda n: (n, 0, 0, 0)),       # x (NCHW)
                pl.BlockSpec((H, Hh),       lambda n: (0, 0)),             # Uh
                pl.BlockSpec((Wh, W),       lambda n: (0, 0)),             # Uw^T
            ],
            out_specs=pl.BlockSpec((1, Cx, H, W), lambda n: (n, 0, 0, 0)),
        ),
        compiler_params=cparams,
    )(a2d, x, Uh, UwT)

    return out


# ---------------------------------------------------------------------------
# Pure-JAX reference (same math as the PyTorch forward) for verification.
# ---------------------------------------------------------------------------
def reference_forward(x, g, wx_w, wg_w, wg_b, psi_w, psi_b):
    N, Cx, H, W = x.shape
    _, Cg, Hg, Wg = g.shape
    Hh, Wh = H // 2, W // 2
    out_c = wx_w.shape[0]

    xp = (x.reshape(N, Cx, Hh, 2, Wh, 2)
            .transpose(0, 2, 4, 1, 3, 5)
            .reshape(N, Hh, Wh, Cx * 4))
    Wx = jnp.einsum("nijk,ok->nijo", xp, wx_w.reshape(out_c, Cx * 4))

    wg = jnp.einsum("ncpq,oc->npqo", g, wg_w.reshape(out_c, Cg)) + wg_b

    Mh, Mw = bilinear_matrix(Hh, Hg), bilinear_matrix(Wh, Wg)
    wg_r = jnp.einsum("ip,jq,npqo->nijo", Mh, Mw, wg)

    f = jnp.maximum(Wx + wg_r, 0.0)
    a = jax.nn.sigmoid(jnp.einsum("nijo,o->nij", f, psi_w.reshape(out_c)) + psi_b[0])

    Uh, Uw = bilinear_matrix(H, Hh), bilinear_matrix(W, Wh)
    a_up = jnp.einsum("ri,sj,nij->nrs", Uh, Uw, a)
    return a_up[:, None, :, :] * x


if __name__ == "__main__":
    key = jax.random.PRNGKey(0)
    ks = jax.random.split(key, 7)

    # small deterministic shapes consistent with the module
    N, Cx, Cg, out_c, H, W = 2, 4, 6, 8, 16, 16
    x = jax.random.normal(ks[0], (N, Cx, H, W), jnp.float32)
    g = jax.random.normal(ks[1], (N, Cg, H, W), jnp.float32)

    params = {
        "wx_w":  0.1 * jax.random.normal(ks[2], (out_c, Cx, 2, 2), jnp.float32),  # W_x conv, no bias
        "wg_w":  0.1 * jax.random.normal(ks[3], (out_c, Cg, 1, 1), jnp.float32),  # W_g conv
        "wg_b":  0.1 * jax.random.normal(ks[4], (out_c,), jnp.float32),           # W_g bias
        "psi_w": 0.1 * jax.random.normal(ks[5], (1, out_c, 1, 1), jnp.float32),   # psi conv
        "psi_b": 0.1 * jax.random.normal(ks[6], (1,), jnp.float32),               # psi bias
    }

    out = attention_gate(x, g, params)
    jax.block_until_ready(out)

    ref = reference_forward(x, g, params["wx_w"], params["wg_w"], params["wg_b"],
                            params["psi_w"], params["psi_b"])
    assert out.shape == x.shape, (out.shape, x.shape)
    # NOTE: tolerance kept at 1e-2 (not 1e-5) because TPU's default f32 matmul
    # precision (bf16 MXU passes) applies to both the XLA reference and the
    # in-kernel dots; the kernel and reference associate the (exactly
    # commuting) resize/conv steps in different orders.
    assert jnp.allclose(out, ref, atol=1e-2, rtol=1e-2), float(jnp.max(jnp.abs(out - ref)))

    print("KERNEL_OK")
</pallas_src>

<mosaic_0001>
module attributes {stable_mosaic.version = 11 : i64} {
  func.func @_gate_map_kernel(%arg0: i32, %arg1: memref<1x16x64xf32, #tpu.memory_space<vmem>>, %arg2: memref<1x6x64xf32, #tpu.memory_space<vmem>>, %arg3: memref<8x16xf32, #tpu.memory_space<vmem>>, %arg4: memref<8x6xf32, #tpu.memory_space<vmem>>, %arg5: memref<8x1xf32, #tpu.memory_space<vmem>>, %arg6: memref<8x1xf32, #tpu.memory_space<vmem>>, %arg7: memref<1x1xf32, #tpu.memory_space<vmem>>, %arg8: memref<1x1x64xf32, #tpu.memory_space<vmem>>) attributes {dimension_semantics = [#tpu.dimension_semantics<parallel>], iteration_bounds = array<i64: 2>, scalar_prefetch = 0 : i64, scratch_operands = 0 : i64, tpu.core_type = #tpu.core_type<tc>, window_params = [{transform_indices = @transform_0, window_bounds = array<i64: 1, 16, 64>}, {transform_indices = @transform_1, window_bounds = array<i64: 1, 6, 64>}, {pipeline_mode = #tpu.pipeline_mode<synchronous>, transform_indices = @transform_2, window_bounds = array<i64: 8, 16>}, {pipeline_mode = #tpu.pipeline_mode<synchronous>, transform_indices = @transform_3, window_bounds = array<i64: 8, 6>}, {pipeline_mode = #tpu.pipeline_mode<synchronous>, transform_indices = @transform_4, window_bounds = array<i64: 8, 1>}, {pipeline_mode = #tpu.pipeline_mode<synchronous>, transform_indices = @transform_5, window_bounds = array<i64: 8, 1>}, {pipeline_mode = #tpu.pipeline_mode<synchronous>, transform_indices = @transform_6, window_bounds = array<i64: 1, 1>}, {transform_indices = @transform_7, window_bounds = array<i64: 1, 1, 64>}]} {
    %c0 = arith.constant 0 : index
    %c0_0 = arith.constant 0 : index
    %0 = vector.load %arg3[%c0, %c0_0] : memref<8x16xf32, #tpu.memory_space<vmem>>, vector<8x16xf32>
    %c0_1 = arith.constant 0 : index
    %c0_2 = arith.constant 0 : index
    %c0_3 = arith.constant 0 : index
    %1 = vector.load %arg1[%c0_1, %c0_2, %c0_3] : memref<1x16x64xf32, #tpu.memory_space<vmem>>, vector<1x16x64xf32>
    %2 = vector.shape_cast %1 : vector<1x16x64xf32> to vector<16x64xf32>
    %cst = arith.constant dense<0.000000e+00> : vector<8x64xf32>
    %3 = tpu.matmul %0, %2, %cst {dimension_numbers = #tpu.dot_dimension_numbers<[1], [0], [0], [1], [0, 0, 1, 1], [], []>} : vector<8x16xf32>, vector<16x64xf32>, vector<8x64xf32> -> vector<8x64xf32>
    %c0_4 = arith.constant 0 : index
    %c0_5 = arith.constant 0 : index
    %4 = vector.load %arg4[%c0_4, %c0_5] : memref<8x6xf32, #tpu.memory_space<vmem>>, vector<8x6xf32>
    %c0_6 = arith.constant 0 : index
    %c0_7 = arith.constant 0 : index
    %c0_8 = arith.constant 0 : index
    %5 = vector.load %arg2[%c0_6, %c0_7, %c0_8] : memref<1x6x64xf32, #tpu.memory_space<vmem>>, vector<1x6x64xf32>
    %6 = vector.shape_cast %5 : vector<1x6x64xf32> to vector<6x64xf32>
    %cst_9 = arith.constant dense<0.000000e+00> : vector<8x64xf32>
    %7 = tpu.matmul %4, %6, %cst_9 {dimension_numbers = #tpu.dot_dimension_numbers<[1], [0], [0], [1], [0, 0, 1, 1], [], []>} : vector<8x6xf32>, vector<6x64xf32>, vector<8x64xf32> -> vector<8x64xf32>
    %c0_10 = arith.constant 0 : index
    %c0_11 = arith.constant 0 : index
    %8 = vector.load %arg5[%c0_10, %c0_11] : memref<8x1xf32, #tpu.memory_space<vmem>>, vector<8x1xf32>
    %9 = vector.broadcast %8 : vector<8x1xf32> to vector<8x64xf32>
    %10 = arith.addf %7, %9 : vector<8x64xf32>
    %11 = arith.addf %3, %10 : vector<8x64xf32>
    %cst_12 = arith.constant 0.000000e+00 : f32
    %12 = vector.broadcast %cst_12 : f32 to vector<8x64xf32>
    %13 = arith.maximumf %11, %12 : vector<8x64xf32>
    %c0_13 = arith.constant 0 : index
    %c0_14 = arith.constant 0 : index
    %14 = vector.load %arg6[%c0_13, %c0_14] : memref<8x1xf32, #tpu.memory_space<vmem>>, vector<8x1xf32>
    %15 = vector.broadcast %14 : vector<8x1xf32> to vector<8x64xf32>
    %16 = arith.mulf %13, %15 : vector<8x64xf32>
    %cst_15 = arith.constant dense<0.000000e+00> : vector<64xf32>
    %17 = vector.multi_reduction <add>, %16, %cst_15 [0] : vector<8x64xf32> to vector<64xf32>
    %18 = vector.shape_cast %17 : vector<64xf32> to vector<1x64xf32>
    %c0_16 = arith.constant 0 : index
    %c0_17 = arith.constant 0 : index
    %19 = vector.load %arg7[%c0_16, %c0_17] : memref<1x1xf32, #tpu.memory_space<vmem>>, vector<1x1xf32>
    %20 = vector.broadcast %19 : vector<1x1xf32> to vector<1x64xf32>
    %21 = arith.addf %18, %20 : vector<1x64xf32>
    %22 = arith.negf %21 : vector<1x64xf32>
    %23 = math.exp %22 : vector<1x64xf32>
    %cst_18 = arith.constant 1.000000e+00 : f32
    %24 = vector.broadcast %cst_18 : f32 to vector<1x64xf32>
    %25 = arith.addf %24, %23 : vector<1x64xf32>
    %26 = arith.divf %24, %25 : vector<1x64xf32>
    %c0_19 = arith.constant 0 : index
    %c0_20 = arith.constant 0 : index
    %c0_21 = arith.constant 0 : index
    %27 = vector.load %arg8[%c0_19, %c0_20, %c0_21] : memref<1x1x64xf32, #tpu.memory_space<vmem>>, vector<1x1x64xf32>
    %28 = vector.shape_cast %27 : vector<1x1x64xf32> to vector<1x64xf32>
    %29 = vector.shape_cast %26 : vector<1x64xf32> to vector<1x1x64xf32>
    tpu.vector_store %arg8[%c0_19, %c0_20, %c0_21], %29 {strides = array<i32>} : memref<1x1x64xf32, #tpu.memory_space<vmem>>, vector<1x1x64xf32>,
    return
  }
  func.func @transform_0(%arg0: i32) -> (i32, i32, i32) {
    %c0_i32 = arith.constant 0 : i32
    %c0_i32_0 = arith.constant 0 : i32
    %c0_i32_1 = arith.constant 0 : i32
    return %arg0, %c0_i32, %c0_i32_0 : i32, i32, i32
  }
  func.func @transform_1(%arg0: i32) -> (i32, i32, i32) {
    %c0_i32 = arith.constant 0 : i32
    %c0_i32_0 = arith.constant 0 : i32
    %c0_i32_1 = arith.constant 0 : i32
    return %arg0, %c0_i32, %c0_i32_0 : i32, i32, i32
  }
  func.func @transform_2(%arg0: i32) -> (i32, i32) {
    %c0_i32 = arith.constant 0 : i32
    %c0_i32_0 = arith.constant 0 : i32
    %c0_i32_1 = arith.constant 0 : i32
    return %c0_i32, %c0_i32_0 : i32, i32
  }
  func.func @transform_3(%arg0: i32) -> (i32, i32) {
    %c0_i32 = arith.constant 0 : i32
    %c0_i32_0 = arith.constant 0 : i32
    %c0_i32_1 = arith.constant 0 : i32
    return %c0_i32, %c0_i32_0 : i32, i32
  }
  func.func @transform_4(%arg0: i32) -> (i32, i32) {
    %c0_i32 = arith.constant 0 : i32
    %c0_i32_0 = arith.constant 0 : i32
    %c0_i32_1 = arith.constant 0 : i32
    return %c0_i32, %c0_i32_0 : i32, i32
  }
  func.func @transform_5(%arg0: i32) -> (i32, i32) {
    %c0_i32 = arith.constant 0 : i32
    %c0_i32_0 = arith.constant 0 : i32
    %c0_i32_1 = arith.constant 0 : i32
    return %c0_i32, %c0_i32_0 : i32, i32
  }
  func.func @transform_6(%arg0: i32) -> (i32, i32) {
    %c0_i32 = arith.constant 0 : i32
    %c0_i32_0 = arith.constant 0 : i32
    %c0_i32_1 = arith.constant 0 : i32
    return %c0_i32, %c0_i32_0 : i32, i32
  }
  func.func @transform_7(%arg0: i32) -> (i32, i32, i32) {
    %c0_i32 = arith.constant 0 : i32
    %c0_i32_0 = arith.constant 0 : i32
    %c0_i32_1 = arith.constant 0 : i32
    return %arg0, %c0_i32, %c0_i32_0 : i32, i32, i32
  }
}

</mosaic_0001>

<bundles_post_ra>
// kernel: tpu_custom_call.1
= control target key start
LH: loop header
LB: loop body
LE: loop exit
PB: predicated region body
PF: predicated region fallthrough
CT: control target
= control target key end

     0   :  { %s954_s0 = inlined_call_operand.vmem [shape: f32[2,16,64], index: 0, kind: input, shape index: {}]   ;;  %s955_s1 = inlined_call_operand.vmem [shape: f32[2,6,64], index: 1, kind: input, shape index: {}]   ;;  %s956_s2 = inlined_call_operand.hbm [shape: f32[8,16], index: 2, kind: input, shape index: {}]   ;;  %s957_s3 = inlined_call_operand.vmem [shape: f32[8,6], index: 3, kind: input, shape index: {}]   ;;  %s958_s4 = inlined_call_operand.vmem [shape: f32[8,1], index: 4, kind: input, shape index: {}]   ;;  %s959_s5 = inlined_call_operand.vmem [shape: f32[8,1], index: 5, kind: input, shape index: {}]   ;;  %s960_s6 = inlined_call_operand.<no memory space> [shape: f32[1,1], index: 6, kind: input, shape index: {}]   ;;  %s961_s7 = inlined_call_operand.hbm [shape: f32[2,1,64], index: 7, kind: output, shape index: {}]  }
   0x1   :  { %v12_v0 = vstv %s960_s6 }
   0x2   :  { %13 = vst [vmem:[#allocation2] sm:$0x1] %v12_v0 }
   0x3   :  { %14 = vsyncpa [#allocation4], 0 }
   0x4   :  { %15 = vsyncpa [#allocation5], 0 }
   0x5   :  { %17 = vsyncpa [#allocation5 + $0x1], 0  ;;  %s831_s26 = smov 0   ;;  %s833_s27 = smov 0  }
   0x6   :  { %s835_s28 = smov 0   ;;  %s837_s29 = smov 0  }
   0x7 LB: > { %s852_s6 = sadd.s32 4294967295, %s781_s29   ;;  %s598_s30 = sadd.s32 4294967294, %s781_s29   ;;  %s781_s29 = sphi %s837_s29, %s969_s29   ;;  %s777_s28 = sphi %s835_s28, %s968_s28   ;;  %s773_s27 = sphi %s833_s27, %s967_s27   ;;  %s769_s26 = sphi %s831_s26, %s966_s26  }
   0x8   : > { %s856_s8 = sadd.s32 1, %s781_s29   ;;  %s187_s9 = sadd.s32 1, %s777_s28 }
   0x9   : > { %s184_s10 = ssub.s32 %s781_s29, %s856_s8  ;;  %p197_p0 = scmp.ne.s32.totalorder %s777_s28, %s773_s27 }
   0xa   : > { %p185_p1 = scmp.eq.s32.totalorder %s184_s10, 0  ;;  %p198_p2 = scmp.eq.s32.totalorder %s852_s6, 1 }
   0xb   : > { %p203_p3 = scmp.ne.s32.totalorder %s773_s27, %s769_s26  ;;  %p204_p4 = scmp.eq.s32.totalorder %s598_s30, 1 }
   0xc   : > { %s867_s11 = scalar_select %p185_p1, %s777_s28, %s187_s9  }
   0xd   : > { %p869_p5 = por %p198_p2, %p197_p0  ;;  %p873_p6 = por %p204_p4, %p203_p3 }
   0xe   : > { %p599_p7 = scmp.ge.s32.totalorder %s781_s29, 1  ;;  %p211_p8 = scmp.lt.s32.totalorder %s781_s29, 3 }
   0xf   : > { %s963_s13 = scalar_select %p873_p6, 1, 0 }
  0x10   : > { %p646_p9 = scmp.eq.s32.totalorder %s852_s6, 0  ;;  %p880_p10 = pnand %p599_p7, %p211_p8 }
  0x11   : > { %s783_s15 = smov [#allocation3]  }
  0x12   : > { %s224_s16 = sshll.u32 %s783_s15, 4  ;;  %p638_p11 = pneg %p880_p10  ;;  %s225_s16 = int_to_ptr.vmem [resolvable:$true] %s224_s16 }
  0x13   : > { %s702_s17 = scalar_lea.vmem %s225_s16, 128  ;;  %p710_p3 = scmp.lt.s32.totalorder %s225_s16, %s225_s16 }
  0x14   : > { %p639_p12 = pnand %p646_p9, %p638_p11  ;;  %p703_p0 = scmp.ne.s32.totalorder %s225_s16, %s702_s17 }
  0x15   : > { %p711_p4 = scmp.lt.s32.totalorder %s702_s17, %s702_s17 }
  0x16   : > { %p693_p13 = pneg %p639_p12 }
  0x17   : > { %p712_p6 = por %p711_p4, %p710_p3 }
  0x18   : > { %p705_p1 = pnand %p703_p0, %p693_p13 }
  0x1a   : > { %p706_p2 = pneg %p705_p1 }
  0x1c   : > { %p713_p7 = pnand %p712_p6, %p706_p2 }
  0x1e   : > { %716 = shalt.err (!%p713_p7)
}
  0x1f   : > { %641 = dma.hbm_to_vmem [thread:$0]  (!%p639_p12), %s956_s2, 128, %s225_s16, [#allocation4]  }
  0x20   : > { %264 = sbr.rel (%p880_p10) target bundleno = 307 (0x133), region = 48 }
  0x25   : > { %760 = dma.done.wait (%p646_p9), [#allocation4], 128  }
  0x26   : > { %762 = vsyncadd (%p646_p9), [#allocation4], 4294967168  ;;  %p299_p8 = scmp.lt.s32.totalorder %s852_s6, 1  ;;  %v784_v1 = vmov 0.0   ;;  %vm785_vm0 = vmmov 0   ;;  %v786_v2 = vmov 0   ;;  %v493_v20 = vlaneseq }
  0x27   : > { %620 = vmatprep.subr.mxu0 %v784_v1  ;;  %625 = vmatprep.subr.mxu1 %v784_v1  ;;  %vm323_vm1 = vcmask 1045504   ;;  %vm319_vm2 = vcmask 48128   ;;  %v311_v5 = vld [vmem:[%s957_s3] sm:$0xff]  ;;  %vm397_vm3 = vcmask 130048   ;;  %vm479_vm4 = vcmask 523264   ;;  %s787_s14 = smov [#allocation6]  }
  0x28   : > { %s300_s20 = scalar_select %p299_p8, %s852_s6, 1  ;;  %622 = vmatprep.mubr.msk.f32.mxu0 %vm785_vm0, %v784_v1  ;;  %629 = vmatprep.mubr.msk.f32.mxu1 %vm785_vm0, %v784_v1  ;;  %v308_v7 = vld [vmem:[#allocation3] sm:$0xff]  ;;  %v487_v9 = vld [vmem:[#allocation2] sm:$0x1]  ;;  %v494_v24 = vshrl.u32 %v493_v20, 7  ;;  %vm504_vm5 = vcmask 516096  }
  0x29   : > { %685 = vset.pattern.permute.xlu0 %v786_v2  ;;  %686 = vset.pattern.permute.xlu1 %v786_v2  ;;  %v313_v8 = vld [vmem:[%s958_s4] sm:$0xff]  ;;  %s721_s15 = sshll.u32 %s787_s14, 4  ;;  %s722_s15 = int_to_ptr.vmem [resolvable:$false] %s721_s15 }
  0x2a   : > { %s606_s21 = sshll.u32 %s300_s20, 3  ;;  %s614_s22 = sshll.u32 %s300_s20, 4  ;;  %316 = vperm.xlu0 %685, %v313_v8   ;;  %v472_v10 = vld [vmem:[%s959_s5] sm:$0xff]  ;;  %490 = vperm.xlu1 %686, %v487_v9   ;;  %v495_v27 = vsub.s32 0, %v494_v24 }
  0x2b   : > { %s307_s25 = scalar_lea.vmem %s955_s1, %s606_s21  ;;  %s303_s10 = scalar_lea.vmem %s954_s0, %s614_s22 }
  0x2c   : > { %v312_v3 = vld [vmem:[%s307_s25] sm:$0x3f]  ;;  %v310_v4 = vld [vmem:[%s303_s10 + $0x8] sm:$0xff]  ;;  %s297_s20 = sand.u32 1, %s773_s27   ;;  %s611_s21 = sshll.u32 %s852_s6, 4 }
  0x2d   : > { %621 = vmatpush3.msk.msra.mxu0 %vm323_vm1, %v312_v3  ;;  %626 = vmatpush3.msra.mxu1 %v310_v4  ;;  %v309_v6 = vld [vmem:[%s303_s10] sm:$0xff]  ;;  %s298_s22 = scalar_lea.vmem [#allocation6], %s297_s20  ;;  %s919_s30 = scalar_lea.hbm %s961_s7, %s611_s21 }
  0x2e   : > { %623 = vmatmul.mubr.msk.f32.vlgmr.msra.gmra.mxu0 %vm319_vm2, %v311_v5  ;;  %627 = vmatprep.subr.mxu1 %v784_v1  ;;  %s519_s23 = sshll.u32 %s298_s22, 4  ;;  %s507_s9 = scalar_lea.sflag [#allocation5], %s297_s20  ;;  %s520_s23 = int_to_ptr.vmem [resolvable:$true] %s519_s23 }
  0x2f   : > { %628 = vmatpush3.msra.mxu1 %v309_v6  ;;  %475 = vperm.xlu0 %685, %v472_v10   ;;  %s717_s10 = scalar_lea.vmem %s520_s23, 16  ;;  %s723_s6 = scalar_lea.vmem %s722_s15, 32 }
  0x30   : > { %630 = vmatmul.mubr.msk.f32.vlgmr.msra.gmra.mxu1 %vm397_vm3, %v308_v7  ;;  %p718_p6 = scmp.ne.s32.totalorder %s520_s23, %s717_s10  ;;  %p724_p11 = scmp.lt.s32.totalorder %s520_s23, %s722_s15 }
  0x31   : > { %p725_p12 = scmp.lt.s32.totalorder %s723_s6, %s717_s10 }
  0x32   : > { %p719_p9 = pnand %p718_p6, %p869_p5 }
  0x33   : > { %p726_p13 = por %p725_p12, %p724_p11 }
  0x34   : > { %p720_p10 = pneg %p719_p9 }
  0x36   : > { %p727_p0 = pnand %p726_p13, %p720_p10 }
  0xa5   : > { %v317_v11 = vpop.permute.xlu0 %316  ;;  %v491_v28 = vpop.permute.xlu1 %490 }
  0xa6   : > { %v496_v31 = vrot.slane %v491_v28, %v495_v27 }
  0xaa   : > { %v476_v19 = vpop.permute.xlu0 %475 }
  0xee   : > { %v393_v12 = vpop.f32.mrf.mxu0 }
  0xef   : > { %v394_v13 = vadd.f32 %v393_v12, %v317_v11 }
  0xf0   : > { %v624_v14 = vpop.f32.mrf.mxu0  ;;  %v467_v15 = vpop.f32.mrf.mxu1 }
  0xf1   : > { %v468_v16 = vadd.f32 %v467_v15, %v394_v13 }
  0xf2   : > { %v631_v17 = vpop.f32.mrf.mxu1 }
  0xf3   : > { %v471_v18 = vmax.f32 %v468_v16, 0.0 }
  0xf5   : > { %v478_v21 = vmul.f32 %v476_v19, %v471_v18 }
  0xf7   : > { %v480_v22 = vsel %vm479_vm4, %v478_v21, 0.0 }
  0xf8   : > { %v481_v23 = vrot.slane %v480_v22, 4 }
  0xfa   : > { %v482_v25 = vadd.f32 %v481_v23, %v480_v22 }
  0xfc   : > { %v483_v26 = vrot.slane %v482_v25, 2 }
  0xfe   : > { %v484_v29 = vadd.f32 %v483_v26, %v482_v25 }
 0x100   : > { %v485_v30 = vrot.slane %v484_v29, 1 }
 0x102   : > { %v486_v32 = vadd.f32 %v485_v30, %v484_v29 }
 0x104   : > { %v497_v33 = vadd.f32 %v496_v31, %v486_v32 }
 0x106   : > { %v610_v34 = vmul.f32 -1.442695, %v497_v33 }
 0x108   : > { %687 = vpow2.f32 %v610_v34 }
 0x115   : > { %v688_v35 = vpop.eup %687 }
 0x116   : > { %v501_v36 = vadd.f32 1.0, %v688_v35 }
 0x118   : > { %689 = vrcp.f32 %v501_v36 }
 0x125   : > { %v690_v37 = vpop.eup %689 }
 0x126   : > { %505 = vst.msk [vmem:[%s298_s22] sm:$0x1] %vm504_vm5, %v690_v37 }
 0x127   : > { %730 = shalt.err (!%p727_p0)
}
 0x128   : > { %s731_s16 = scalar_lea.hbm %s919_s30, 16  ;;  %s735_s19 = scalar_lea.hbm %s961_s7, 32 }
 0x129   : > { %p732_p1 = scmp.ne.s32.totalorder %s919_s30, %s731_s16  ;;  %p736_p4 = scmp.lt.s32.totalorder %s919_s30, %s961_s7 }
 0x12a   : > { %p737_p7 = scmp.lt.s32.totalorder %s735_s19, %s731_s16 }
 0x12b   : > { %p733_p2 = pnand %p732_p1, %p869_p5 }
 0x12c   : > { %p738_p8 = por %p737_p7, %p736_p4 }
 0x12d   : > { %p734_p3 = pneg %p733_p2 }
 0x12f   : > { %p739_p6 = pnand %p738_p8, %p734_p3 }
 0x131   : > { %742 = shalt.err (!%p739_p6)
}
 0x132   : > { %636 = dma.vmem_to_hbm [thread:$0]  (%p869_p5), %s520_s23, 16, %s919_s30, %s507_s9  }
 0x133 PF: > { %p648_p9 = scmp.ge.s32.totalorder %s781_s29, 2  ;;  %s531_s22 = sand.u32 1, %s769_s26  }
 0x134   : > { %p965_p10 = scmp.ne.s32.totalorder %s963_s13, 0  ;;  %s532_s24 = scalar_lea.sflag [#allocation5], %s531_s22 }
 0x136   : > { %p643_p11 = pnand %p648_p9, %p965_p10 }
 0x138   : > { %p644_p12 = pneg %p643_p11 }
 0x13a   : > { %764 = dma.done.wait (%p644_p12), %s532_s24, 16  }
 0x13b   : > { %766 = vsyncadd (%p644_p12), %s532_s24, 4294967280  ;;  %p20_p13 = scmp.ge.s32.totalorder %s856_s8, 4   ;;  %s966_s26 = smov %s773_s27 }
 0x13c   : > { %s967_s27 = smov %s777_s28  ;;  %s968_s28 = smov %s867_s11 }
 0x13d   : > { %s969_s29 = smov %s856_s8  ;;  %22 = sbr.rel (!%p20_p13) target bundleno = 7 (0x7), region = 91 }
 0x142   :  { %536 = vsyncpa [#allocation4], 1 }
 0x143   :  { %538 = vsyncpa [#allocation4 + $0x1], 1 }
 0x144   :  { %539 = vsyncpa [#allocation5], 1 }
 0x145   :  { %541 = vsyncpa [#allocation5 + $0x1], 1 }

</bundles_post_ra>
